<compile_context>
chip_gen: v7x
topology: tpu7x:2x2x1
jax: 0.10.0
libtpu: 0.0.40
codegen_flags: <defaults>
</compile_context>

<pallas_src>
import functools

import jax
import jax.numpy as jnp
from jax.experimental import pallas as pl
from jax.experimental.pallas import tpu as pltpu


def _round_up(x: int, m: int) -> int:
    return (x + m - 1) // m * m


def _largest_divisor_tile(padded: int, align: int, cap: int):
    """Largest multiple of `align` that divides `padded` and is <= cap, else None."""
    best = None
    t = align
    limit = min(cap, padded)
    while t <= limit:
        if padded % t == 0:
            best = t
        t += align
    return best


def _linear_sigmoid_kernel(x_ref, wt_ref, b_ref, o_ref, *, approx_recip):
    # x_ref: (tm, tk)   wt_ref: (tk, tn)   b_ref: (1, tn) f32   o_ref: (tm, tn) f32
    # o_ref doubles as the f32 accumulator: its block index ignores the K grid
    # axis, so the same VMEM tile stays resident across all k steps.
    k = pl.program_id(2)

    @pl.when(k == 0)
    def _():
        o_ref[...] = jnp.zeros_like(o_ref)

    o_ref[...] += jnp.dot(
        x_ref[...], wt_ref[...], preferred_element_type=jnp.float32
    )

    @pl.when(k == pl.num_programs(2) - 1)
    def _():
        z = o_ref[...] + b_ref[...]          # bias add in f32
        denom = 1.0 + jnp.exp(-z)            # exp on the EUP
        if approx_recip:
            o_ref[...] = pl.reciprocal(denom, approx=True)   # EUP, off the VALU
        else:
            o_ref[...] = 1.0 / denom


def make_linear_block(w, b, *, use_bf16=True, approx_recip=True,
                      tm_cap=512, tn_cap=512, tk_cap=None):
    """Prepare a LinearBlock forward: returns f(x) = sigmoid(x @ w.T + b).

    w: [Cout, Cin] (PyTorch nn.Linear layout), b: [Cout].
    Weight transpose / padding / dtype cast happen ONCE here, not per call.
    """
    Cout, Cin = w.shape
    assert b.shape == (Cout,), "bias shape mismatch"
    op_dtype = jnp.bfloat16 if use_bf16 else jnp.float32
    if tk_cap is None:
        tk_cap = 2048 if use_bf16 else 1024
    align_m = 16 if use_bf16 else 8           # bf16 packs 16 rows per vreg

    Kp = _round_up(Cin, 128)
    Np = _round_up(Cout, 128)
    tk = _largest_divisor_tile(Kp, 128, tk_cap)
    tn = _largest_divisor_tile(Np, 128, tn_cap)

    # Hoisted weight/bias prep: transpose once, pad once, cast once.
    wt = jnp.zeros((Kp, Np), op_dtype).at[:Cin, :Cout].set(w.T.astype(op_dtype))
    bp = jnp.zeros((1, Np), jnp.float32).at[0, :Cout].set(b.astype(jnp.float32))
    wt, bp = jax.device_put(wt), jax.device_put(bp)

    kernel = functools.partial(_linear_sigmoid_kernel, approx_recip=approx_recip)

    @jax.jit
    def apply(x):
        B, Cin_x = x.shape
        assert Cin_x == Cin, "input feature mismatch"
        out_dtype = x.dtype

        Bp = _round_up(B, align_m)
        tm = _largest_divisor_tile(Bp, align_m, tm_cap)
        tn_l = tn

        # v7x: ensure at least one "parallel" axis has >= 2 blocks so both
        # TensorCores get work (free on single-core v5e/v6e).
        if Bp // tm == 1 and Np // tn_l == 1:
            tm_split = _largest_divisor_tile(Bp, align_m, Bp // 2)
            if tm_split is not None:
                tm = tm_split
            else:
                tn_split = _largest_divisor_tile(Np, 128, Np // 2)
                if tn_split is not None:
                    tn_l = tn_split

        grid = (Bp // tm, Np // tn_l, Kp // tk)

        # Only pad / copy x when it is not already tile-aligned.
        if Bp == B and Kp == Cin:
            xp = x.astype(op_dtype)
        else:
            xp = jnp.zeros((Bp, Kp), op_dtype).at[:B, :Cin].set(x.astype(op_dtype))

        # Tile VMEM footprint: double-buffered inputs + double-buffered f32
        # output (also the accumulator) + bias.  Explicit limit, v7x-safe.
        dsize = 2 if use_bf16 else 4
        footprint = (2 * (tm * tk + tk * tn_l) * dsize
                     + 2 * tm * tn_l * 4 + 2 * tn_l * 4)
        vmem_limit = min(max(32 * 1024 * 1024, 2 * footprint), 48 * 1024 * 1024)

        out = pl.pallas_call(
            kernel,
            out_shape=jax.ShapeDtypeStruct((Bp, Np), jnp.float32),
            grid_spec=pltpu.PrefetchScalarGridSpec(
                num_scalar_prefetch=0,
                grid=grid,
                in_specs=[
                    pl.BlockSpec((tm, tk), lambda i, j, k: (i, k)),    # x tile
                    pl.BlockSpec((tk, tn_l), lambda i, j, k: (k, j)),  # W^T tile
                    pl.BlockSpec((1, tn_l), lambda i, j, k: (0, j)),   # bias tile
                ],
                out_specs=pl.BlockSpec((tm, tn_l), lambda i, j, k: (i, j)),
            ),
            compiler_params=pltpu.CompilerParams(
                dimension_semantics=("parallel", "parallel", "arbitrary"),
                vmem_limit_bytes=vmem_limit,
            ),
        )(xp, wt, bp)

        out = out[:B, :Cout]
        return out if out_dtype == jnp.float32 else out.astype(out_dtype)

    return apply


def linear_block(x, w, b, **kwargs):
    """One-shot convenience wrapper (weight prep not amortized across calls)."""
    return make_linear_block(w, b, **kwargs)(x)


if __name__ == "__main__":
    key = jax.random.PRNGKey(0)
    k1, k2, k3, k4, k5, k6, k7, k8, k9 = jax.random.split(key, 9)

    # --- Check 1: small shape, exact f32 path (strict tolerance) ---
    B0, Cin0, Cout0 = 8, 32, 32
    bound0 = 1.0 / (Cin0 ** 0.5)
    x0 = jax.random.normal(k1, (B0, Cin0), dtype=jnp.float32)
    w0 = jax.random.uniform(k2, (Cout0, Cin0), minval=-bound0, maxval=bound0,
                            dtype=jnp.float32)
    b0 = jax.random.uniform(k3, (Cout0,), minval=-bound0, maxval=bound0,
                            dtype=jnp.float32)
    f0 = make_linear_block(w0, b0, use_bf16=False, approx_recip=False)
    out0 = jax.block_until_ready(f0(x0))
    ref0 = jax.nn.sigmoid(x0 @ w0.T + b0)
    assert out0.shape == (B0, Cout0)
    assert jnp.allclose(out0, ref0, atol=1e-5, rtol=1e-5)

    # --- Check 2: default path (bf16 MXU operands, approx reciprocal); the
    #     640/384 shape now tiles with ZERO padding (tk=640, tn=384) and the
    #     single output tile is split across M for v7x's two cores ---
    B1, Cin1, Cout1 = 256, 640, 384
    bound1 = 1.0 / (Cin1 ** 0.5)
    x1 = jax.random.normal(k4, (B1, Cin1), dtype=jnp.float32)
    w1 = jax.random.uniform(k5, (Cout1, Cin1), minval=-bound1, maxval=bound1,
                            dtype=jnp.float32)
    b1 = jax.random.uniform(k6, (Cout1,), minval=-bound1, maxval=bound1,
                            dtype=jnp.float32)
    f1 = make_linear_block(w1, b1)            # weight prep hoisted, done once
    out1 = jax.block_until_ready(f1(x1))
    ref1 = jax.nn.sigmoid(x1 @ w1.T + b1)
    assert out1.shape == (B1, Cout1)
    assert jnp.allclose(out1, ref1, atol=2e-2, rtol=2e-2)
    out1b = jax.block_until_ready(f1(x1))     # second call reuses prepared W^T
    assert jnp.allclose(out1b, ref1, atol=2e-2, rtol=2e-2)

    # --- Check 3: multi-step K accumulation (tk_cap forces K grid > 1) ---
    B2, Cin2, Cout2 = 64, 384, 256
    bound2 = 1.0 / (Cin2 ** 0.5)
    x2 = jax.random.normal(k7, (B2, Cin2), dtype=jnp.float32)
    w2 = jax.random.uniform(k8, (Cout2, Cin2), minval=-bound2, maxval=bound2,
                            dtype=jnp.float32)
    b2 = jax.random.uniform(k9, (Cout2,), minval=-bound2, maxval=bound2,
                            dtype=jnp.float32)
    f2 = make_linear_block(w2, b2, tk_cap=128)
    out2 = jax.block_until_ready(f2(x2))
    ref2 = jax.nn.sigmoid(x2 @ w2.T + b2)
    assert out2.shape == (B2, Cout2)
    assert jnp.allclose(out2, ref2, atol=2e-2, rtol=2e-2)

    print("KERNEL_OK")
</pallas_src>

<mosaic_0001>
module attributes {stable_mosaic.version = 11 : i64} {
  func.func @_linear_sigmoid_kernel(%arg0: i32, %arg1: i32, %arg2: i32, %arg3: memref<8x128xf32, #tpu.memory_space<vmem>>, %arg4: memref<128x128xf32, #tpu.memory_space<vmem>>, %arg5: memref<1x128xf32, #tpu.memory_space<vmem>>, %arg6: memref<8x128xf32, #tpu.memory_space<vmem>>) attributes {dimension_semantics = [#tpu.dimension_semantics<parallel>, #tpu.dimension_semantics<parallel>, #tpu.dimension_semantics<arbitrary>], iteration_bounds = array<i64: 1, 1, 1>, scalar_prefetch = 0 : i64, scratch_operands = 0 : i64, tpu.core_type = #tpu.core_type<tc>, window_params = [{transform_indices = @transform_0, window_bounds = array<i64: 8, 128>}, {transform_indices = @transform_1, window_bounds = array<i64: 128, 128>}, {transform_indices = @transform_2, window_bounds = array<i64: 1, 128>}, {transform_indices = @transform_3, window_bounds = array<i64: 8, 128>}]} {
    %c0_i32 = arith.constant 0 : i32
    %0 = arith.cmpi eq, %arg2, %c0_i32 : i32
    %1 = arith.extui %0 : i1 to i32
    %c0_i32_0 = arith.constant 0 : i32
    %2 = arith.cmpi ne, %1, %c0_i32_0 : i32
    scf.if %2 {
      %cst_10 = arith.constant 0.000000e+00 : f32
      %12 = vector.broadcast %cst_10 : f32 to vector<8x128xf32>
      %c0_11 = arith.constant 0 : index
      %c0_12 = arith.constant 0 : index
      %13 = vector.load %arg6[%c0_11, %c0_12] : memref<8x128xf32, #tpu.memory_space<vmem>>, vector<8x128xf32>
      tpu.vector_store %arg6[%c0_11, %c0_12], %12 {strides = array<i32>} : memref<8x128xf32, #tpu.memory_space<vmem>>, vector<8x128xf32>,
    } else {
    }
    %c0 = arith.constant 0 : index
    %c0_1 = arith.constant 0 : index
    %3 = vector.load %arg6[%c0, %c0_1] : memref<8x128xf32, #tpu.memory_space<vmem>>, vector<8x128xf32>
    %c0_2 = arith.constant 0 : index
    %c0_3 = arith.constant 0 : index
    %4 = vector.load %arg3[%c0_2, %c0_3] : memref<8x128xf32, #tpu.memory_space<vmem>>, vector<8x128xf32>
    %c0_4 = arith.constant 0 : index
    %c0_5 = arith.constant 0 : index
    %5 = vector.load %arg4[%c0_4, %c0_5] : memref<128x128xf32, #tpu.memory_space<vmem>>, vector<128x128xf32>
    %cst = arith.constant dense<0.000000e+00> : vector<8x128xf32>
    %6 = tpu.matmul %4, %5, %cst {dimension_numbers = #tpu.dot_dimension_numbers<[1], [0], [0], [1], [0, 0, 1, 1], [], []>} : vector<8x128xf32>, vector<128x128xf32>, vector<8x128xf32> -> vector<8x128xf32>
    %7 = arith.addf %3, %6 : vector<8x128xf32>
    %c0_6 = arith.constant 0 : index
    %c0_7 = arith.constant 0 : index
    %8 = vector.load %arg6[%c0_6, %c0_7] : memref<8x128xf32, #tpu.memory_space<vmem>>, vector<8x128xf32>
    tpu.vector_store %arg6[%c0_6, %c0_7], %7 {strides = array<i32>} : memref<8x128xf32, #tpu.memory_space<vmem>>, vector<8x128xf32>,
    %c0_i32_8 = arith.constant 0 : i32
    %9 = arith.cmpi eq, %arg2, %c0_i32_8 : i32
    %10 = arith.extui %9 : i1 to i32
    %c0_i32_9 = arith.constant 0 : i32
    %11 = arith.cmpi ne, %10, %c0_i32_9 : i32
    scf.if %11 {
      %c0_10 = arith.constant 0 : index
      %c0_11 = arith.constant 0 : index
      %12 = vector.load %arg6[%c0_10, %c0_11] : memref<8x128xf32, #tpu.memory_space<vmem>>, vector<8x128xf32>
      %c0_12 = arith.constant 0 : index
      %c0_13 = arith.constant 0 : index
      %13 = vector.load %arg5[%c0_12, %c0_13] : memref<1x128xf32, #tpu.memory_space<vmem>>, vector<1x128xf32>
      %14 = vector.broadcast %13 : vector<1x128xf32> to vector<8x128xf32>
      %15 = arith.addf %12, %14 : vector<8x128xf32>
      %cst_14 = arith.constant 0.000000e+00 : f32
      %16 = vector.broadcast %cst_14 : f32 to vector<8x128xf32>
      %17 = arith.subf %16, %15 : vector<8x128xf32>
      %18 = math.exp %17 : vector<8x128xf32>
      %cst_15 = arith.constant 1.000000e+00 : f32
      %19 = vector.broadcast %cst_15 : f32 to vector<8x128xf32>
      %20 = arith.addf %19, %18 : vector<8x128xf32>
      %cst_16 = arith.constant 1.000000e+00 : f32
      %21 = vector.broadcast %cst_16 : f32 to vector<8x128xf32>
      %22 = arith.divf %21, %20 : vector<8x128xf32>
      %c0_17 = arith.constant 0 : index
      %c0_18 = arith.constant 0 : index
      %23 = vector.load %arg6[%c0_17, %c0_18] : memref<8x128xf32, #tpu.memory_space<vmem>>, vector<8x128xf32>
      tpu.vector_store %arg6[%c0_17, %c0_18], %22 {strides = array<i32>} : memref<8x128xf32, #tpu.memory_space<vmem>>, vector<8x128xf32>,
    } else {
    }
    return
  }
  func.func @transform_0(%arg0: i32, %arg1: i32, %arg2: i32) -> (i32, i32) {
    %c0_i32 = arith.constant 0 : i32
    return %arg0, %arg2 : i32, i32
  }
  func.func @transform_1(%arg0: i32, %arg1: i32, %arg2: i32) -> (i32, i32) {
    %c0_i32 = arith.constant 0 : i32
    return %arg2, %arg1 : i32, i32
  }
  func.func @transform_2(%arg0: i32, %arg1: i32, %arg2: i32) -> (i32, i32) {
    %c0_i32 = arith.constant 0 : i32
    %c0_i32_0 = arith.constant 0 : i32
    return %c0_i32, %arg1 : i32, i32
  }
  func.func @transform_3(%arg0: i32, %arg1: i32, %arg2: i32) -> (i32, i32) {
    %c0_i32 = arith.constant 0 : i32
    return %arg0, %arg1 : i32, i32
  }
}

</mosaic_0001>

<bundles_post_ra>
// kernel: apply.1
= control target key start
LH: loop header
LB: loop body
LE: loop exit
PB: predicated region body
PF: predicated region fallthrough
CT: control target
= control target key end

     0   :  { %8 = vsyncpa [#allocation3], 0  ;;  %s351_s0 = inlined_call_operand.vmem [shape: f32[8,128], index: 0, kind: input, shape index: {}]   ;;  %s352_s1 = inlined_call_operand.hbm [shape: f32[128,128], index: 1, kind: input, shape index: {}]   ;;  %s353_s2 = inlined_call_operand.vmem [shape: f32[1,128], index: 2, kind: input, shape index: {}]   ;;  %s354_s3 = inlined_call_operand.hbm [shape: f32[8,128], index: 3, kind: output, shape index: {}]  }
   0x1   :  { %9 = vsyncpa [#allocation4], 0  ;;  %s294_s12 = smov [#allocation2]   ;;  %s246_s16 = scalar_lea.hbm %s352_s1, 2048 }
   0x2   :  { %s17_s13 = sshll.u32 %s294_s12, 4  ;;  %p247_p0 = scmp.ne.s32.totalorder %s352_s1, %s246_s16  ;;  %s18_s13 = int_to_ptr.vmem [resolvable:$true] %s17_s13 }
   0x3   :  { %p250_p1 = scmp.lt.u32.totalorder %s246_s16, %s352_s1 }
   0x5   :  { %p252_p2 = pnand %p250_p1, %p247_p0 }
   0x7   :  { %255 = shalt.err (!%p252_p2)
}
   0x8   :  { %s256_s21 = scalar_lea.vmem %s18_s13, 2048  ;;  %p261_p4 = scmp.lt.s32.totalorder %s18_s13, %s18_s13 }
   0x9   :  { %p257_p3 = scmp.ne.s32.totalorder %s18_s13, %s256_s21  ;;  %p262_p5 = scmp.lt.s32.totalorder %s256_s21, %s256_s21 }
   0xb   :  { %p263_p6 = por %p262_p5, %p261_p4 }
   0xd   :  { %p264_p7 = pnand %p263_p6, %p257_p3 }
   0xf   :  { %267 = shalt.err (!%p264_p7)
}
  0x10   :  { %s295_s22 = smov 128   ;;  %s296_s23 = smov 8  }
  0x11   :  { %23 = dma.hbm_to_vmem [thread:$0]  %s352_s1, 2048, %s18_s13, [#allocation3], %s295_s22, %s295_s22, %s296_s23  }
  0x12   :  { %290 = dma.done.wait [#allocation3], 2048  }
  0x13   :  { %291 = vsyncadd [#allocation3], 4294965248  ;;  %v297_v0 = vmov 0.0|0.0   ;;  %vm298_vm0 = vmmov 0   ;;  %v299_v1 = vmov 0.0   ;;  %v36_v2 = vld [vmem:[#allocation2] sm:$0xff] }
  0x14   :  { %211 = vmatprep.subr.bf16.mxu0 %v297_v0  ;;  %208 = vmatprep.mubr.msk.f32.mxu0 %vm298_vm0, %v299_v1  ;;  %v37_v3 = vld [vmem:[#allocation2 + $0x8] sm:$0xff]  ;;  %v38_v4 = vld [vmem:[#allocation2 + $0x10] sm:$0xff]  ;;  %v39_v6 = vld [vmem:[#allocation2 + $0x18] sm:$0xff]  ;;  %s300_s29 = smov [#allocation5]  }
  0x15   :  { %v212_v5 = vpack.c.bf16 %v37_v3, %v36_v2  ;;  %v215_v7 = vpack.c.bf16 %v39_v6, %v38_v4  ;;  %v40_v8 = vld [vmem:[#allocation2 + $0x20] sm:$0xff]  ;;  %v41_v9 = vld [vmem:[#allocation2 + $0x28] sm:$0xff]  ;;  %v42_v11 = vld [vmem:[#allocation2 + $0x30] sm:$0xff]  ;;  %s149_s30 = sshll.u32 %s300_s29, 4  ;;  %s150_s30 = int_to_ptr.vmem [resolvable:$true] %s149_s30 }
  0x16   :  { %v218_v10 = vpack.c.bf16 %v41_v9, %v40_v8  ;;  %v43_v12 = vld [vmem:[#allocation2 + $0x38] sm:$0xff]  ;;  %v44_v14 = vld [vmem:[#allocation2 + $0x40] sm:$0xff]  ;;  %v45_v15 = vld [vmem:[#allocation2 + $0x48] sm:$0xff]  ;;  %p273_p9 = scmp.lt.s32.totalorder %s150_s30, %s150_s30 }
  0x17   :  { %213 = vmatpush3.bf16.msra.mxu0 %v212_v5  ;;  %v221_v13 = vpack.c.bf16 %v43_v12, %v42_v11  ;;  %v224_v16 = vpack.c.bf16 %v45_v15, %v44_v14  ;;  %v46_v17 = vld [vmem:[#allocation2 + $0x50] sm:$0xff]  ;;  %v47_v18 = vld [vmem:[#allocation2 + $0x58] sm:$0xff]  ;;  %v48_v20 = vld [vmem:[#allocation2 + $0x60] sm:$0xff] }
  0x18   :  { %214 = vmatprep.subr.bf16.mxu0 %v297_v0  ;;  %v227_v19 = vpack.c.bf16 %v47_v18, %v46_v17  ;;  %v49_v21 = vld [vmem:[#allocation2 + $0x68] sm:$0xff]  ;;  %v50_v23 = vld [vmem:[#allocation2 + $0x70] sm:$0xff]  ;;  %v51_v24 = vld [vmem:[#allocation2 + $0x78] sm:$0xff] }
  0x19   :  { %v230_v22 = vpack.c.bf16 %v49_v21, %v48_v20  ;;  %v233_v25 = vpack.c.bf16 %v51_v24, %v50_v23  ;;  %v35_v26 = vld [vmem:[%s351_s0] sm:$0xff]  ;;  %s268_s0 = scalar_lea.vmem %s150_s30, 128 }
  0x1a   :  { %v158_v28 = vld [vmem:[%s353_s2] ss:$0 sm:$0xff]  ;;  %p269_p8 = scmp.ne.s32.totalorder %s150_s30, %s268_s0  ;;  %p274_p10 = scmp.lt.s32.totalorder %s268_s0, %s268_s0 }
  0x1b   :  { %216 = vmatpush3.bf16.msra.mxu0 %v215_v7 }
  0x1c   :  { %217 = vmatprep.subr.bf16.mxu0 %v297_v0  ;;  %p275_p11 = por %p274_p10, %p273_p9 }
  0x1e   :  { %p276_p12 = pnand %p275_p11, %p269_p8 }
  0x1f   :  { %219 = vmatpush3.bf16.msra.mxu0 %v218_v10 }
  0x20   :  { %220 = vmatprep.subr.bf16.mxu0 %v297_v0 }
  0x23   :  { %222 = vmatpush3.bf16.msra.mxu0 %v221_v13 }
  0x24   :  { %223 = vmatprep.subr.bf16.mxu0 %v297_v0 }
  0x27   :  { %225 = vmatpush3.bf16.msra.mxu0 %v224_v16 }
  0x28   :  { %226 = vmatprep.subr.bf16.mxu0 %v297_v0 }
  0x2b   :  { %228 = vmatpush3.bf16.msra.mxu0 %v227_v19 }
  0x2c   :  { %229 = vmatprep.subr.bf16.mxu0 %v297_v0 }
  0x2f   :  { %231 = vmatpush3.bf16.msra.mxu0 %v230_v22 }
  0x30   :  { %232 = vmatprep.subr.bf16.mxu0 %v297_v0 }
  0x33   :  { %234 = vmatpush3.bf16.msra.mxu0 %v233_v25 }
  0x36   :  { %209 = vmatmul.mubr.f32.vlgmr.msra.gmra.mrb[0].mxu0 %v35_v26 }
 0x109   :  { %v118_v27 = vpop.f32.mrb[0].mxu0 }
 0x10a   :  { %v210_v29 = vpop.f32.mrb[1].mxu0  ;;  %v135_v30 = vadd.f32 %v158_v28, %v118_v27 }
 0x10c   :  { %v136_v31 = vsub.f32 0.0, %v135_v30 }
 0x10e   :  { %v137_v32 = vmul.f32 1.442695, %v136_v31 }
 0x110   :  { %242 = vpow2.f32 %v137_v32 }
 0x11a   :  { %v243_v33 = vpop.eup %242 }
 0x11b   :  { %v139_v34 = vadd.f32 1.0, %v243_v33 }
 0x11d   :  { %244 = vrcp.f32 %v139_v34 }
 0x127   :  { %v245_v35 = vpop.eup %244 }
 0x128   :  { %142 = vst [vmem:[#allocation5] sm:$0xff] %v245_v35 }
 0x129   :  { %279 = shalt.err (!%p276_p12)
}
 0x12a   :  { %s280_s5 = scalar_lea.hbm %s354_s3, 128 }
 0x12b   :  { %p281_p13 = scmp.ne.s32.totalorder %s354_s3, %s280_s5  ;;  %p284_p0 = scmp.lt.u32.totalorder %s280_s5, %s354_s3 }
 0x12d   :  { %p286_p1 = pnand %p284_p0, %p281_p13 }
 0x12f   :  { %289 = shalt.err (!%p286_p1)
}
 0x130   :  { %152 = dma.vmem_to_hbm [thread:$0]  %s150_s30, 128, %s354_s3, [#allocation4]  }
 0x131   :  { %292 = dma.done.wait [#allocation4], 128  }
 0x132   :  { %293 = vsyncadd [#allocation4], 4294967168 }
 0x133   :  { %156 = vsyncpa [#allocation3], 1 }
 0x134   :  { %157 = vsyncpa [#allocation4], 1 }

</bundles_post_ra>
